<compile_context>
chip_gen: v5e
topology: v5e:2x2
jax: 0.10.0
libtpu: 0.0.40
codegen_flags: <defaults>
</compile_context>

<pallas_src>
import functools
import math

import jax
import jax.numpy as jnp
from jax.experimental import pallas as pl
from jax.experimental.pallas import tpu as pltpu


def _round_up(x, m):
    return ((x + m - 1) // m) * m


# ----------------------------------------------------------------------------
# Generation-aware tile defaults.
# ----------------------------------------------------------------------------
def _default_tiles():
    """(tm, tn, tk, vmem_limit_bytes) per TPU generation.

    Per-step arithmetic intensity ~ tm*tn/(tm+tn) FLOP per byte of bf16
    operand traffic.  Compute-bound crossover: v5e ~240, v7x ~310, v6e ~650.
    """
    try:
        kind = jax.devices()[0].device_kind.lower()
    except Exception:
        kind = ""
    if "v6" in kind:
        # v6e: 128 MiB physical VMEM, highest FLOP/byte ratio -> mega tiles.
        # Resident set ~22-30 MiB -> raise the scoped VMEM limit.
        return 1024, 2048, 512, 96 * 1024 * 1024
    # v5e (16 MiB default scoped VMEM) and v7x (64 MiB VMEM, 3.2 TB/s HBM,
    # 2 TCs): 512x1024 is already at/above the crossover and leaves headroom;
    # the parallel i/j grid axes feed both v7x TensorCores.
    return 512, 1024, 512, 64 * 1024 * 1024


def _plan_kn(K, N, tn, tk):
    """Lane-dense tiling of the (K, N) weight with no partial j blocks."""
    tn = max(128, _round_up(tn, 128))
    N_pad = _round_up(N, 128)
    tn = min(tn, N_pad)
    if N_pad % tn != 0:
        # Prefer a tn that divides N_pad (no masked partial stores); fall back
        # to padding N up to a multiple of tn if that would shrink tn too much.
        cand = tn
        while cand > 128 and N_pad % cand != 0:
            cand -= 128
        if cand >= tn // 2:
            tn = cand
        else:
            N_pad = _round_up(N_pad, tn)

    tk = max(256, _round_up(tk, 256))
    if K <= max(tk, 2048):
        # Keep K whole (single "arbitrary" step), padded lane-dense (>=128).
        K_pad = _round_up(K, 128)
        tk_eff = K_pad
    else:
        tk_eff = tk
        K_pad = _round_up(K, tk_eff)
    return tn, tk_eff, K_pad, N_pad


# ----------------------------------------------------------------------------
# Hoisted, cacheable per-parameter prep (transpose + pad + cast).
# ----------------------------------------------------------------------------
def prepare_dp_linear_params(weight, bias=None, *, tn=None, tk=None,
                             compute_dtype=jnp.bfloat16):
    """Prepare (and cache across calls) the weight/bias operands.

    weight: (out_features, in_features)  -- PyTorch nn.Linear layout
    bias:   (out_features,) or None
    """
    out_features, in_features = weight.shape
    _, d_tn, d_tk, _ = _default_tiles()
    tn = d_tn if tn is None else tn
    tk = d_tk if tk is None else tk
    tn, tk_eff, K_pad, N_pad = _plan_kn(in_features, out_features, tn, tk)

    w_t = weight.T  # (K, N): contraction dim first, output dim lane-dense
    if K_pad != in_features or N_pad != out_features:
        w_t = jnp.pad(w_t, ((0, K_pad - in_features),
                            (0, N_pad - out_features)))
    w_t = w_t.astype(compute_dtype)

    bias_row = None
    if bias is not None:
        bias_row = bias.astype(jnp.float32).reshape(1, out_features)
        if N_pad != out_features:
            bias_row = jnp.pad(bias_row, ((0, 0), (0, N_pad - out_features)))

    return dict(w_t=w_t, bias_row=bias_row, K=in_features, N=out_features,
                K_pad=K_pad, N_pad=N_pad, tn=tn, tk_eff=tk_eff,
                compute_dtype=compute_dtype)


# ----------------------------------------------------------------------------
# Kernel.
# ----------------------------------------------------------------------------
def _dp_linear_kernel(*refs, has_bias, use_scratch):
    # refs layout:
    #   with bias:    x_ref, w_ref, b_ref, o_ref [, acc_scratch]
    #   without bias: x_ref, w_ref,        o_ref [, acc_scratch]
    if use_scratch:
        *refs, acc_scratch = refs
    else:
        acc_scratch = None
    if has_bias:
        x_ref, w_ref, b_ref, o_ref = refs
    else:
        x_ref, w_ref, o_ref = refs
        b_ref = None

    # f32 outputs accumulate directly into the resident output block (its
    # index_map ignores k), saving tm*tn*4 B of VMEM and the epilogue pass.
    acc_ref = acc_scratch if use_scratch else o_ref
    k = pl.program_id(2)

    @pl.when(k == 0)
    def _init():
        if b_ref is not None:
            acc_ref[...] = jnp.broadcast_to(
                b_ref[...].astype(acc_ref.dtype), acc_ref.shape)
        else:
            acc_ref[...] = jnp.zeros_like(acc_ref)

    # In-kernel cast of x rides the (slack) VPU slot in an MXU-bound GEMM; it
    # is a no-op when the wrapper already cast x to the compute dtype.
    acc_ref[...] += jnp.dot(x_ref[...].astype(w_ref.dtype), w_ref[...],
                            preferred_element_type=jnp.float32)

    if use_scratch:
        @pl.when(k == pl.num_programs(2) - 1)
        def _store():
            o_ref[...] = acc_ref[...].astype(o_ref.dtype)


# ----------------------------------------------------------------------------
# Wrapper.
# ----------------------------------------------------------------------------
def dp_linear(x, weight=None, bias=None, *, prepared=None, tm=None, tn=None,
              tk=None, compute_dtype=jnp.bfloat16, out_dtype=None,
              vmem_limit_bytes=None):
    """Forward of DPLinear: x @ W^T + bias.

    x:      (..., in_features)
    weight: (out_features, in_features) -- ignored if `prepared` is given
    bias:   (out_features,) or None     -- ignored if `prepared` is given
    prepared: result of prepare_dp_linear_params (hoist/cache across calls)
    """
    d_tm, _, _, d_vmem = _default_tiles()
    tm = d_tm if tm is None else tm
    vmem_limit_bytes = d_vmem if vmem_limit_bytes is None else vmem_limit_bytes

    if prepared is None:
        assert weight is not None, "Either `weight` or `prepared` is required."
        prepared = prepare_dp_linear_params(
            weight, bias, tn=tn, tk=tk, compute_dtype=compute_dtype)

    w_t = prepared["w_t"]
    bias_row = prepared["bias_row"]
    K, N = prepared["K"], prepared["N"]
    K_pad, N_pad = prepared["K_pad"], prepared["N_pad"]
    tn_eff, tk_eff = prepared["tn"], prepared["tk_eff"]
    compute_dtype = prepared["compute_dtype"]

    assert x.shape[-1] == K
    lead_shape = x.shape[:-1]
    M = int(math.prod(lead_shape)) if lead_shape else 1
    out_dtype = x.dtype if out_dtype is None else out_dtype

    # ---- M tile sizing ------------------------------------------------------
    sublane = 16 if jnp.dtype(compute_dtype).itemsize == 2 else 8
    tm = max(sublane, min(tm, _round_up(M, sublane)))
    tm = _round_up(tm, sublane)

    grid = (pl.cdiv(M, tm), N_pad // tn_eff, K_pad // tk_eff)
    n_i, n_j = grid[0], grid[1]

    # ---- Activation prep ----------------------------------------------------
    x2d = x.reshape(M, K)
    if K_pad != K:
        x2d = jnp.pad(x2d, ((0, 0), (0, K_pad - K)))
    # Pre-casting x to bf16 costs an extra HBM pass over the activations; only
    # worth it when X is streamed many times (many column tiles of the output).
    if x2d.dtype != compute_dtype and n_j > 2:
        x2d = x2d.astype(compute_dtype)

    has_bias = bias_row is not None
    use_scratch = jnp.dtype(out_dtype) != jnp.float32

    kernel = functools.partial(_dp_linear_kernel, has_bias=has_bias,
                               use_scratch=use_scratch)

    in_specs = [
        pl.BlockSpec((tm, tk_eff), lambda i, j, k: (i, k)),   # x tile
        pl.BlockSpec((tk_eff, tn_eff), lambda i, j, k: (k, j)),  # W^T tile
    ]
    operands = [x2d, w_t]
    if has_bias:
        in_specs.append(pl.BlockSpec((1, tn_eff), lambda i, j, k: (0, j)))
        operands.append(bias_row)

    scratch_shapes = ([pltpu.VMEM((tm, tn_eff), jnp.float32)]
                      if use_scratch else [])

    # Byte traffic including revisits: X streamed once per j tile, W streamed
    # once per i tile, bias once per i tile, output written once.
    cost = pl.CostEstimate(
        flops=2 * M * K_pad * N_pad,
        transcendentals=0,
        bytes_accessed=(
            n_j * x2d.size * x2d.dtype.itemsize
            + n_i * w_t.size * w_t.dtype.itemsize
            + (n_i * bias_row.size * 4 if has_bias else 0)
            + M * N_pad * jnp.dtype(out_dtype).itemsize),
    )

    out2d = pl.pallas_call(
        kernel,
        out_shape=jax.ShapeDtypeStruct((M, N_pad), out_dtype),
        grid_spec=pltpu.PrefetchScalarGridSpec(
            num_scalar_prefetch=0,
            grid=grid,
            in_specs=in_specs,
            out_specs=pl.BlockSpec((tm, tn_eff), lambda i, j, k: (i, j)),
            scratch_shapes=scratch_shapes,
        ),
        compiler_params=pltpu.CompilerParams(
            dimension_semantics=("parallel", "parallel", "arbitrary"),
            vmem_limit_bytes=vmem_limit_bytes),
        cost_estimate=cost,
    )(*operands)

    if N_pad != N:
        out2d = out2d[:, :N]
    return out2d.reshape(lead_shape + (N,))


if __name__ == "__main__":
    # Small shapes consistent with a DPLinear projection on sequence data.
    B, T = 2, 8
    in_features, out_features = 32, 64

    key = jax.random.PRNGKey(0)
    k_x, k_w, k_b = jax.random.split(key, 3)

    x = jax.random.normal(k_x, (B, T, in_features), dtype=jnp.float32)
    # Kaiming-uniform(a=sqrt(5)) init as in DPLinear.reset_parameters:
    # weight bound = 1/sqrt(fan_in), bias bound = 1/sqrt(fan_in).
    bound = 1.0 / math.sqrt(in_features)
    weight = jax.random.uniform(k_w, (out_features, in_features),
                                dtype=jnp.float32, minval=-bound, maxval=bound)
    bias = jax.random.uniform(k_b, (out_features,), dtype=jnp.float32,
                              minval=-bound, maxval=bound)

    # Reference with the same bf16 operand rounding + f32 accumulation.
    x_bf = x.reshape(-1, in_features).astype(jnp.bfloat16).astype(jnp.float32)
    w_bf = weight.T.astype(jnp.bfloat16).astype(jnp.float32)
    ref_b = (x_bf @ w_bf + bias).reshape(B, T, out_features)
    ref_nb = (x_bf @ w_bf).reshape(B, T, out_features)

    # 1) Hoisted / cached weight prep path (f32 output, direct accumulation).
    prepared = prepare_dp_linear_params(weight, bias)
    out = jax.block_until_ready(dp_linear(x, prepared=prepared))
    assert out.shape == (B, T, out_features)
    assert jnp.allclose(out, ref_b, atol=2e-3, rtol=2e-3), float(
        jnp.max(jnp.abs(out - ref_b)))

    # 2) Direct path (per-call prep) must match.
    out2 = jax.block_until_ready(dp_linear(x, weight, bias))
    assert jnp.allclose(out2, out, atol=1e-6, rtol=1e-6)

    # 3) bias=None path (no bias operand DMA'd).
    out_nb = jax.block_until_ready(dp_linear(x, weight, None))
    assert jnp.allclose(out_nb, ref_nb, atol=2e-3, rtol=2e-3)

    # 4) Low-precision output path (f32 VMEM scratch accumulator).
    out_bf = jax.block_until_ready(
        dp_linear(x, weight, bias, out_dtype=jnp.bfloat16))
    assert jnp.allclose(out_bf.astype(jnp.float32), ref_b, atol=1e-2, rtol=1e-2)

    # TODO(synk): DPLinear's backward (per-sample ghost-norm clipping + DP
    # noise in LinearFunction.backward) is a custom autograd path, not part of
    # the forward kernel.
    print("KERNEL_OK")
</pallas_src>

<mosaic_0001>
module attributes {stable_mosaic.version = 11 : i64} {
  func.func @_dp_linear_kernel(%arg0: i32, %arg1: i32, %arg2: i32, %arg3: memref<16x128xf32, #tpu.memory_space<vmem>>, %arg4: memref<128x128xbf16, #tpu.memory_space<vmem>>, %arg5: memref<1x128xf32, #tpu.memory_space<vmem>>, %arg6: memref<16x128xf32, #tpu.memory_space<vmem>>) attributes {dimension_semantics = [#tpu.dimension_semantics<parallel>, #tpu.dimension_semantics<parallel>, #tpu.dimension_semantics<arbitrary>], iteration_bounds = array<i64: 1, 1, 1>, scalar_prefetch = 0 : i64, scratch_operands = 0 : i64, tpu.core_type = #tpu.core_type<tc>, window_params = [{transform_indices = @transform_0, window_bounds = array<i64: 16, 128>}, {transform_indices = @transform_1, window_bounds = array<i64: 128, 128>}, {transform_indices = @transform_2, window_bounds = array<i64: 1, 128>}, {transform_indices = @transform_3, window_bounds = array<i64: 16, 128>}]} {
    %c0_i32 = arith.constant 0 : i32
    %0 = arith.cmpi eq, %arg2, %c0_i32 : i32
    %1 = arith.extui %0 : i1 to i32
    %c0_i32_0 = arith.constant 0 : i32
    %2 = arith.cmpi ne, %1, %c0_i32_0 : i32
    scf.if %2 {
      %c0_8 = arith.constant 0 : index
      %c0_9 = arith.constant 0 : index
      %10 = vector.load %arg5[%c0_8, %c0_9] : memref<1x128xf32, #tpu.memory_space<vmem>>, vector<1x128xf32>
      %11 = vector.shape_cast %10 : vector<1x128xf32> to vector<1x128xf32>
      %12 = vector.broadcast %11 : vector<1x128xf32> to vector<16x128xf32>
      %c0_10 = arith.constant 0 : index
      %c0_11 = arith.constant 0 : index
      %13 = vector.load %arg6[%c0_10, %c0_11] : memref<16x128xf32, #tpu.memory_space<vmem>>, vector<16x128xf32>
      tpu.vector_store %arg6[%c0_10, %c0_11], %12 {strides = array<i32>} : memref<16x128xf32, #tpu.memory_space<vmem>>, vector<16x128xf32>,
    } else {
    }
    %c0 = arith.constant 0 : index
    %c0_1 = arith.constant 0 : index
    %3 = vector.load %arg6[%c0, %c0_1] : memref<16x128xf32, #tpu.memory_space<vmem>>, vector<16x128xf32>
    %c0_2 = arith.constant 0 : index
    %c0_3 = arith.constant 0 : index
    %4 = vector.load %arg3[%c0_2, %c0_3] : memref<16x128xf32, #tpu.memory_space<vmem>>, vector<16x128xf32>
    %5 = arith.truncf %4 : vector<16x128xf32> to vector<16x128xbf16>
    %c0_4 = arith.constant 0 : index
    %c0_5 = arith.constant 0 : index
    %6 = vector.load %arg4[%c0_4, %c0_5] : memref<128x128xbf16, #tpu.memory_space<vmem>>, vector<128x128xbf16>
    %cst = arith.constant dense<0.000000e+00> : vector<16x128xf32>
    %7 = tpu.matmul %5, %6, %cst {dimension_numbers = #tpu.dot_dimension_numbers<[1], [0], [0], [1], [0, 0, 1, 1], [], []>} : vector<16x128xbf16>, vector<128x128xbf16>, vector<16x128xf32> -> vector<16x128xf32>
    %8 = arith.addf %3, %7 : vector<16x128xf32>
    %c0_6 = arith.constant 0 : index
    %c0_7 = arith.constant 0 : index
    %9 = vector.load %arg6[%c0_6, %c0_7] : memref<16x128xf32, #tpu.memory_space<vmem>>, vector<16x128xf32>
    tpu.vector_store %arg6[%c0_6, %c0_7], %8 {strides = array<i32>} : memref<16x128xf32, #tpu.memory_space<vmem>>, vector<16x128xf32>,
    return
  }
  func.func @transform_0(%arg0: i32, %arg1: i32, %arg2: i32) -> (i32, i32) {
    %c0_i32 = arith.constant 0 : i32
    return %arg0, %arg2 : i32, i32
  }
  func.func @transform_1(%arg0: i32, %arg1: i32, %arg2: i32) -> (i32, i32) {
    %c0_i32 = arith.constant 0 : i32
    return %arg2, %arg1 : i32, i32
  }
  func.func @transform_2(%arg0: i32, %arg1: i32, %arg2: i32) -> (i32, i32) {
    %c0_i32 = arith.constant 0 : i32
    %c0_i32_0 = arith.constant 0 : i32
    return %c0_i32, %arg1 : i32, i32
  }
  func.func @transform_3(%arg0: i32, %arg1: i32, %arg2: i32) -> (i32, i32) {
    %c0_i32 = arith.constant 0 : i32
    return %arg0, %arg1 : i32, i32
  }
}

</mosaic_0001>

<bundles_post_ra>
// kernel: tpu_custom_call.1
= control target key start
LH: loop header
LB: loop body
LE: loop exit
PB: predicated region body
PF: predicated region fallthrough
CT: control target
= control target key end

     0   :  { %8 = vsyncpa [#allocation3], 0  ;;  %s335_s0 = inlined_call_operand.hbm [shape: f32[16,128], index: 0, kind: input, shape index: {}]   ;;  %s336_s1 = inlined_call_operand.hbm [shape: bf16[128,128], index: 1, kind: input, shape index: {}]   ;;  %s337_s2 = inlined_call_operand.vmem [shape: f32[1,128], index: 2, kind: input, shape index: {}]   ;;  %s338_s3 = inlined_call_operand.hbm [shape: f32[16,128], index: 3, kind: output, shape index: {}]  }
   0x1   :  { %9 = vsyncpa [#allocation6], 0 }
   0x2   :  { %10 = vsyncpa [#allocation4], 0  ;;  %s15_s14 = sshll.u32 %s335_s0, 4  ;;  %s290_s15 = smov [#allocation2]   ;;  %s16_s14 = int_to_ptr.hbm [resolvable:$true] %s15_s14 }
   0x3   :  { %s17_s16 = sshll.u32 %s290_s15, 4  ;;  %s28_s19 = sshll.u32 %s336_s1, 4  ;;  %s18_s16 = int_to_ptr.vmem [resolvable:$true] %s17_s16  ;;  %s29_s19 = int_to_ptr.hbm [resolvable:$true] %s28_s19 }
   0x4   :  { %s291_s20 = smov 128   ;;  %s292_s21 = smov 8  }
   0x5   :  { %23 = dma.hbm_to_vmem [thread:$0]  %s16_s14, 256, %s18_s16, [#allocation3], %s291_s20, %s291_s20, %s292_s21  }
   0x6   :  { %s293_s22 = smov [#allocation5]   ;;  %s294_s24 = smov 64  }
   0x7   :  { %s30_s23 = sshll.u32 %s293_s22, 4  ;;  %s295_s0 = smov 4   ;;  %s31_s23 = int_to_ptr.vmem [resolvable:$true] %s30_s23 }
   0x8   :  { %36 = dma.hbm_to_vmem [thread:$0]  %s29_s19, 1024, %s31_s23, [#allocation6], %s294_s24, %s294_s24, %s295_s0  }
   0x9   :  { %284 = dma.done.wait [#allocation3], 256  }
   0xa   :  { %285 = vsyncadd [#allocation3], 4294967040 }
   0xb   :  { %286 = dma.done.wait [#allocation6], 1024  }
   0xc   :  { %287 = vsyncadd [#allocation6], 4294966272  ;;  %v203_v0 = vld [vmem:[#allocation5 + $0x38] sm:$0xff]  ;;  %v202_v1 = vld [vmem:[#allocation5 + $0x30] sm:$0xff]  ;;  %s296_s26 = smov [#allocation7]   ;;  %s150_s30 = sshll.u32 %s338_s3, 4  ;;  %s151_s30 = int_to_ptr.hbm [resolvable:$true] %s150_s30 }
   0xd   :  { %126 = vmatpush.bf16.msra.mxu0 %v203_v0  ;;  %v201_v2 = vld [vmem:[#allocation5 + $0x28] sm:$0xff]  ;;  %v200_v3 = vld [vmem:[#allocation5 + $0x20] sm:$0xff]  ;;  %v199_v4 = vld [vmem:[#allocation5 + $0x18] sm:$0xff]  ;;  %s148_s27 = sshll.u32 %s296_s26, 4  ;;  %s149_s27 = int_to_ptr.vmem [resolvable:$true] %s148_s27 }
   0xe   :  { %v198_v5 = vld [vmem:[#allocation5 + $0x10] sm:$0xff]  ;;  %v197_v6 = vld [vmem:[#allocation5 + $0x8] sm:$0xff]  ;;  %v196_v7 = vld [vmem:[#allocation5] sm:$0xff] }
   0xf   :  { %v59_v8 = vld [vmem:[#allocation2] sm:$0xff]  ;;  %v60_v9 = vld [vmem:[#allocation2 + $0x8] sm:$0xff] }
  0x10   :  { %v61_v10 = vpack.c.bf16 %v60_v9, %v59_v8  ;;  %v211_v11 = vld [vmem:[%s337_s2] ss:$0 sm:$0xff] }
  0x11   :  { %127 = vmatpush.bf16.msra.mxu0 %v202_v1 }
  0x15   :  { %128 = vmatpush.bf16.msra.mxu0 %v201_v2 }
  0x19   :  { %129 = vmatpush.bf16.msra.mxu0 %v200_v3 }
  0x1d   :  { %130 = vmatpush.bf16.msra.mxu0 %v199_v4 }
  0x21   :  { %131 = vmatpush.bf16.msra.mxu0 %v198_v5 }
  0x25   :  { %132 = vmatpush.bf16.msra.mxu0 %v197_v6 }
  0x29   :  { %133 = vmatpush.bf16.msra.mxu0 %v196_v7 }
  0x2c   :  { %134 = vmatmul.bf16.vlgmr.msra.gmra.mxu0 %v61_v10 }
  0xa9   :  { %v135_v12 = vpop.f32.mrf.mxu0 }
  0xaa   :  { %v140_v13 = vadd.f32 %v211_v11, %v135_v12 }
  0xac   :  { %142 = vst [vmem:[#allocation7] sm:$0xff] %v140_v13 }
  0xb1   :  { %v137_v14 = vpop.f32.mrf.mxu0 }
  0xb2   :  { %v141_v15 = vadd.f32 %v211_v11, %v137_v14 }
  0xb4   :  { %143 = vst [vmem:[#allocation7 + $0x8] sm:$0xff] %v141_v15 }
  0xb5   :  { %156 = dma.vmem_to_hbm [thread:$0]  %s149_s27, 256, %s151_s30, [#allocation4], %s291_s20, %s291_s20, %s292_s21  }
  0xb6   :  { %288 = dma.done.wait [#allocation4], 256  }
  0xb7   :  { %289 = vsyncadd [#allocation4], 4294967040 }
  0xb8   :  { %161 = vsyncpa [#allocation3], 1 }
  0xb9   :  { %162 = vsyncpa [#allocation6], 1 }
  0xba   :  { %163 = vsyncpa [#allocation4], 1 }

</bundles_post_ra>
